<compile_context>
chip_gen: v5e
topology: v5e:2x2
jax: 0.10.0
libtpu: 0.0.40
codegen_flags: <defaults>
</compile_context>

<pallas_src>
import jax
import jax.numpy as jnp
from jax.experimental import pallas as pl
from jax.experimental.pallas import tpu as pltpu

D_MODEL = 64
NUM_HEADS = 4
HEAD_DIM = D_MODEL // NUM_HEADS
D_FF = 4 * D_MODEL
LN_EPS = 1e-5


def _layernorm(x, gamma, beta):
    # PyTorch LayerNorm: biased variance over last dim, eps inside rsqrt (EUP path).
    mean = jnp.mean(x, axis=-1, keepdims=True)
    var = jnp.mean((x - mean) ** 2, axis=-1, keepdims=True)
    inv = jax.lax.rsqrt(var + LN_EPS)
    return (x - mean) * inv * gamma + beta


def _softmax(s):
    m = jnp.max(s, axis=-1, keepdims=True)
    e = jnp.exp(s - m)
    # Divide on the EUP slot (reciprocal) instead of burning VALU slots.
    return e * pl.reciprocal(jnp.sum(e, axis=-1, keepdims=True), approx=True)


def bert_block_kernel(x_ref,
                      n1w_ref, n1b_ref,
                      wqkv_ref, bqkv_ref,
                      wo_ref, bo_ref,
                      n2w_ref, n2b_ref,
                      w1_ref, b1_ref,
                      w2_ref, b2_ref,
                      o_ref):
    Bt, S, D = x_ref.shape
    # Fold batch into the MXU M dimension (free leading-dim merge; last dim unchanged).
    x = x_ref[...].astype(jnp.float32).reshape(Bt * S, D)          # (Bt*S, D)

    # --- norm1 + self-attention + residual ---
    h = _layernorm(x, n1w_ref[...], n1b_ref[...])                  # (Bt*S, D)
    qkv = jnp.dot(h, wqkv_ref[...],
                  preferred_element_type=jnp.float32) + bqkv_ref[...]
    # Leading-dim split back to (Bt, S, D) so attention never mixes batches.
    q = qkv[:, 0:D].reshape(Bt, S, D)       # 1/sqrt(head_dim) already folded into wqkv
    k = qkv[:, D:2 * D].reshape(Bt, S, D)
    v = qkv[:, 2 * D:3 * D].reshape(Bt, S, D)

    wo = wo_ref[...]                                               # (D, D)
    attn = jnp.zeros((Bt, S, D), jnp.float32)
    for head in range(NUM_HEADS):
        lo = head * HEAD_DIM
        hi = lo + HEAD_DIM
        qh = q[..., lo:hi]                                         # (Bt, S, hd)
        kh = k[..., lo:hi]
        vh = v[..., lo:hi]
        # Batched over Bt; k-transpose folded into the dot_general operand feed.
        scores = jnp.einsum('bqd,bkd->bqk', qh, kh,
                            preferred_element_type=jnp.float32)    # (Bt, S, S)
        probs = _softmax(scores)
        ctx = jnp.einsum('bqk,bkd->bqd', probs, vh,
                         preferred_element_type=jnp.float32)       # (Bt, S, hd)
        # Fold the head merge into the out-projection: no lane-wise concat.
        attn = attn + jnp.einsum('bqd,df->bqf', ctx, wo[lo:hi, :],
                                 preferred_element_type=jnp.float32)
    attn = attn.reshape(Bt * S, D) + bo_ref[...]

    x2 = x + attn                                                  # residual 1

    # --- norm2 + feed-forward + residual ---
    h2 = _layernorm(x2, n2w_ref[...], n2b_ref[...])
    ff = jnp.dot(h2, w1_ref[...], preferred_element_type=jnp.float32) + b1_ref[...]
    ff = jnp.maximum(ff, 0.0)                                      # ReLU
    ff = jnp.dot(ff, w2_ref[...], preferred_element_type=jnp.float32) + b2_ref[...]

    o_ref[...] = (ff + x2).reshape(Bt, S, D).astype(o_ref.dtype)


def toy_bert_block(x, params, *, batch_block=None):
    B, S, D = x.shape
    assert D == D_MODEL
    # Default: the whole batch in a single grid step (no per-step pipeline overhead,
    # weights DMA'd once). On v7x (2 TensorCores/chip) pass batch_block=B//2 to get a
    # 2-step "parallel" grid so both cores get work.
    if batch_block is None:
        batch_block = B
    assert B % batch_block == 0
    grid = (B // batch_block,)

    def full(shape):
        return pl.BlockSpec(shape, lambda b: (0,) * len(shape))

    in_specs = [
        pl.BlockSpec((batch_block, S, D), lambda b: (b, 0, 0)),    # x
        full((1, D)), full((1, D)),                                # norm1 w, b
        full((D, 3 * D)), full((1, 3 * D)),                        # qkv proj
        full((D, D)), full((1, D)),                                # out proj
        full((1, D)), full((1, D)),                                # norm2 w, b
        full((D, D_FF)), full((1, D_FF)),                          # ff1
        full((D_FF, D)), full((1, D)),                             # ff2
    ]

    return pl.pallas_call(
        bert_block_kernel,
        out_shape=jax.ShapeDtypeStruct((B, S, D), x.dtype),
        grid_spec=pltpu.PrefetchScalarGridSpec(
            num_scalar_prefetch=0,
            grid=grid,
            in_specs=in_specs,
            out_specs=pl.BlockSpec((batch_block, S, D), lambda b: (b, 0, 0)),
        ),
        compiler_params=pltpu.CompilerParams(
            dimension_semantics=("parallel",)),
    )(x,
      params["n1w"], params["n1b"],
      params["wqkv"], params["bqkv"],
      params["wo"], params["bo"],
      params["n2w"], params["n2b"],
      params["w1"], params["b1"],
      params["w2"], params["b2"])


def init_params(key):
    ks = jax.random.split(key, 6)
    scale = 0.02
    wqkv = scale * jax.random.normal(ks[0], (D_MODEL, 3 * D_MODEL), jnp.float32)
    bqkv = scale * jax.random.normal(ks[1], (1, 3 * D_MODEL), jnp.float32)
    # One-time host-side fold of the 1/sqrt(head_dim) attention scale into the
    # q-columns of the fused QKV projection (mathematically == scaling q post-proj).
    qscale = 1.0 / (HEAD_DIM ** 0.5)
    wqkv = wqkv.at[:, :D_MODEL].multiply(qscale)
    bqkv = bqkv.at[:, :D_MODEL].multiply(qscale)

    p = {
        # LayerNorms init like PyTorch: weight=1, bias=0
        "n1w": jnp.ones((1, D_MODEL), jnp.float32),
        "n1b": jnp.zeros((1, D_MODEL), jnp.float32),
        "n2w": jnp.ones((1, D_MODEL), jnp.float32),
        "n2b": jnp.zeros((1, D_MODEL), jnp.float32),
        # Attention in-projection (q,k,v fused), stored as (D, 3D) = W^T
        "wqkv": wqkv,
        "bqkv": bqkv,
        # Attention out-projection, stored as (D, D) = W^T
        "wo": scale * jax.random.normal(ks[2], (D_MODEL, D_MODEL), jnp.float32),
        "bo": jnp.zeros((1, D_MODEL), jnp.float32),
        # Feed-forward
        "w1": scale * jax.random.normal(ks[3], (D_MODEL, D_FF), jnp.float32),
        "b1": scale * jax.random.normal(ks[4], (1, D_FF), jnp.float32),
        "w2": scale * jax.random.normal(ks[5], (D_FF, D_MODEL), jnp.float32),
        "b2": jnp.zeros((1, D_MODEL), jnp.float32),
    }
    return p


if __name__ == "__main__":
    key = jax.random.PRNGKey(0)
    k_x, k_p = jax.random.split(key)

    B, S = 2, 8
    x = jax.random.normal(k_x, (B, S, D_MODEL), jnp.float32)
    params = init_params(k_p)

    out = toy_bert_block(x, params)
    out = jax.block_until_ready(out)
    assert out.shape == (B, S, D_MODEL)
    assert jnp.all(jnp.isfinite(out))
    print("KERNEL_OK")
</pallas_src>

<mosaic_0001>
module attributes {stable_mosaic.version = 11 : i64} {
  func.func @bert_block_kernel(%arg0: i32, %arg1: memref<2x8x64xf32, #tpu.memory_space<vmem>>, %arg2: memref<1x64xf32, #tpu.memory_space<vmem>>, %arg3: memref<1x64xf32, #tpu.memory_space<vmem>>, %arg4: memref<64x192xf32, #tpu.memory_space<vmem>>, %arg5: memref<1x192xf32, #tpu.memory_space<vmem>>, %arg6: memref<64x64xf32, #tpu.memory_space<vmem>>, %arg7: memref<1x64xf32, #tpu.memory_space<vmem>>, %arg8: memref<1x64xf32, #tpu.memory_space<vmem>>, %arg9: memref<1x64xf32, #tpu.memory_space<vmem>>, %arg10: memref<64x256xf32, #tpu.memory_space<vmem>>, %arg11: memref<1x256xf32, #tpu.memory_space<vmem>>, %arg12: memref<256x64xf32, #tpu.memory_space<vmem>>, %arg13: memref<1x64xf32, #tpu.memory_space<vmem>>, %arg14: memref<2x8x64xf32, #tpu.memory_space<vmem>>) attributes {dimension_semantics = [#tpu.dimension_semantics<parallel>], iteration_bounds = array<i64: 1>, scalar_prefetch = 0 : i64, scratch_operands = 0 : i64, tpu.core_type = #tpu.core_type<tc>, window_params = [{transform_indices = @transform_0, window_bounds = array<i64: 2, 8, 64>}, {pipeline_mode = #tpu.pipeline_mode<synchronous>, transform_indices = @transform_1, window_bounds = array<i64: 1, 64>}, {pipeline_mode = #tpu.pipeline_mode<synchronous>, transform_indices = @transform_2, window_bounds = array<i64: 1, 64>}, {pipeline_mode = #tpu.pipeline_mode<synchronous>, transform_indices = @transform_3, window_bounds = array<i64: 64, 192>}, {pipeline_mode = #tpu.pipeline_mode<synchronous>, transform_indices = @transform_4, window_bounds = array<i64: 1, 192>}, {pipeline_mode = #tpu.pipeline_mode<synchronous>, transform_indices = @transform_5, window_bounds = array<i64: 64, 64>}, {pipeline_mode = #tpu.pipeline_mode<synchronous>, transform_indices = @transform_6, window_bounds = array<i64: 1, 64>}, {pipeline_mode = #tpu.pipeline_mode<synchronous>, transform_indices = @transform_7, window_bounds = array<i64: 1, 64>}, {pipeline_mode = #tpu.pipeline_mode<synchronous>, transform_indices = @transform_8, window_bounds = array<i64: 1, 64>}, {pipeline_mode = #tpu.pipeline_mode<synchronous>, transform_indices = @transform_9, window_bounds = array<i64: 64, 256>}, {pipeline_mode = #tpu.pipeline_mode<synchronous>, transform_indices = @transform_10, window_bounds = array<i64: 1, 256>}, {pipeline_mode = #tpu.pipeline_mode<synchronous>, transform_indices = @transform_11, window_bounds = array<i64: 256, 64>}, {pipeline_mode = #tpu.pipeline_mode<synchronous>, transform_indices = @transform_12, window_bounds = array<i64: 1, 64>}, {transform_indices = @transform_13, window_bounds = array<i64: 2, 8, 64>}]} {
    %c0 = arith.constant 0 : index
    %c0_0 = arith.constant 0 : index
    %c0_1 = arith.constant 0 : index
    %0 = vector.load %arg1[%c0, %c0_0, %c0_1] : memref<2x8x64xf32, #tpu.memory_space<vmem>>, vector<2x8x64xf32>
    %1 = vector.shape_cast %0 : vector<2x8x64xf32> to vector<16x64xf32>
    %c0_2 = arith.constant 0 : index
    %c0_3 = arith.constant 0 : index
    %2 = vector.load %arg2[%c0_2, %c0_3] : memref<1x64xf32, #tpu.memory_space<vmem>>, vector<1x64xf32>
    %c0_4 = arith.constant 0 : index
    %c0_5 = arith.constant 0 : index
    %3 = vector.load %arg3[%c0_4, %c0_5] : memref<1x64xf32, #tpu.memory_space<vmem>>, vector<1x64xf32>
    %cst = arith.constant dense<0.000000e+00> : vector<16xf32>
    %4 = vector.multi_reduction <add>, %1, %cst [1] : vector<16x64xf32> to vector<16xf32>
    %5 = vector.shape_cast %4 : vector<16xf32> to vector<16x1xf32>
    %cst_6 = arith.constant 6.400000e+01 : f32
    %6 = vector.broadcast %cst_6 : f32 to vector<16x1xf32>
    %7 = arith.divf %5, %6 : vector<16x1xf32>
    %8 = vector.broadcast %7 : vector<16x1xf32> to vector<16x64xf32>
    %9 = arith.subf %1, %8 : vector<16x64xf32>
    %10 = arith.mulf %9, %9 : vector<16x64xf32>
    %cst_7 = arith.constant dense<0.000000e+00> : vector<16xf32>
    %11 = vector.multi_reduction <add>, %10, %cst_7 [1] : vector<16x64xf32> to vector<16xf32>
    %12 = vector.shape_cast %11 : vector<16xf32> to vector<16x1xf32>
    %cst_8 = arith.constant 6.400000e+01 : f32
    %13 = vector.broadcast %cst_8 : f32 to vector<16x1xf32>
    %14 = arith.divf %12, %13 : vector<16x1xf32>
    %cst_9 = arith.constant 9.99999974E-6 : f32
    %15 = vector.broadcast %cst_9 : f32 to vector<16x1xf32>
    %16 = arith.addf %14, %15 : vector<16x1xf32>
    %17 = math.rsqrt %16 : vector<16x1xf32>
    %18 = vector.broadcast %7 : vector<16x1xf32> to vector<16x64xf32>
    %19 = arith.subf %1, %18 : vector<16x64xf32>
    %20 = vector.broadcast %17 : vector<16x1xf32> to vector<16x64xf32>
    %21 = arith.mulf %19, %20 : vector<16x64xf32>
    %22 = vector.broadcast %2 : vector<1x64xf32> to vector<16x64xf32>
    %23 = arith.mulf %21, %22 : vector<16x64xf32>
    %24 = vector.broadcast %3 : vector<1x64xf32> to vector<16x64xf32>
    %25 = arith.addf %23, %24 : vector<16x64xf32>
    %c0_10 = arith.constant 0 : index
    %c0_11 = arith.constant 0 : index
    %26 = vector.load %arg4[%c0_10, %c0_11] : memref<64x192xf32, #tpu.memory_space<vmem>>, vector<64x192xf32>
    %cst_12 = arith.constant dense<0.000000e+00> : vector<16x192xf32>
    %27 = tpu.matmul %25, %26, %cst_12 {dimension_numbers = #tpu.dot_dimension_numbers<[1], [0], [0], [1], [0, 0, 1, 1], [], []>} : vector<16x64xf32>, vector<64x192xf32>, vector<16x192xf32> -> vector<16x192xf32>
    %c0_13 = arith.constant 0 : index
    %c0_14 = arith.constant 0 : index
    %28 = vector.load %arg5[%c0_13, %c0_14] : memref<1x192xf32, #tpu.memory_space<vmem>>, vector<1x192xf32>
    %29 = vector.broadcast %28 : vector<1x192xf32> to vector<16x192xf32>
    %30 = arith.addf %27, %29 : vector<16x192xf32>
    %31 = vector.extract_strided_slice %30 {offsets = [0, 0], sizes = [16, 64], strides = [1, 1]} : vector<16x192xf32> to vector<16x64xf32>
    %32 = vector.shape_cast %31 : vector<16x64xf32> to vector<2x8x64xf32>
    %33 = vector.extract_strided_slice %30 {offsets = [0, 64], sizes = [16, 64], strides = [1, 1]} : vector<16x192xf32> to vector<16x64xf32>
    %34 = vector.shape_cast %33 : vector<16x64xf32> to vector<2x8x64xf32>
    %35 = vector.extract_strided_slice %30 {offsets = [0, 128], sizes = [16, 64], strides = [1, 1]} : vector<16x192xf32> to vector<16x64xf32>
    %36 = vector.shape_cast %35 : vector<16x64xf32> to vector<2x8x64xf32>
    %c0_15 = arith.constant 0 : index
    %c0_16 = arith.constant 0 : index
    %37 = vector.load %arg6[%c0_15, %c0_16] : memref<64x64xf32, #tpu.memory_space<vmem>>, vector<64x64xf32>
    %cst_17 = arith.constant 0.000000e+00 : f32
    %38 = vector.broadcast %cst_17 : f32 to vector<2x8x64xf32>
    %39 = vector.extract_strided_slice %32 {offsets = [0, 0, 0], sizes = [2, 8, 16], strides = [1, 1, 1]} : vector<2x8x64xf32> to vector<2x8x16xf32>
    %40 = vector.extract_strided_slice %34 {offsets = [0, 0, 0], sizes = [2, 8, 16], strides = [1, 1, 1]} : vector<2x8x64xf32> to vector<2x8x16xf32>
    %41 = vector.extract_strided_slice %36 {offsets = [0, 0, 0], sizes = [2, 8, 16], strides = [1, 1, 1]} : vector<2x8x64xf32> to vector<2x8x16xf32>
    "tpu.trace_start"() <{level = 10 : i32, message = "bqd,bkd->bqk"}> : () -> ()
    %cst_18 = arith.constant dense<0.000000e+00> : vector<2x8x8xf32>
    %42 = tpu.matmul %39, %40, %cst_18 {dimension_numbers = #tpu.dot_dimension_numbers<[2], [2], [1], [1], [0, 0, 0, 1, 1, 1], [0], [0]>} : vector<2x8x16xf32>, vector<2x8x16xf32>, vector<2x8x8xf32> -> vector<2x8x8xf32>
    "tpu.trace_stop"() : () -> ()
    %cst_19 = arith.constant dense<0xFF800000> : vector<2x8xf32>
    %43 = vector.multi_reduction <maximumf>, %42, %cst_19 [2] : vector<2x8x8xf32> to vector<2x8xf32>
    %44 = vector.shape_cast %43 : vector<2x8xf32> to vector<2x8x1xf32>
    %45 = vector.broadcast %44 : vector<2x8x1xf32> to vector<2x8x8xf32>
    %46 = arith.subf %42, %45 : vector<2x8x8xf32>
    %47 = math.exp %46 : vector<2x8x8xf32>
    %cst_20 = arith.constant dense<0.000000e+00> : vector<2x8xf32>
    %48 = vector.multi_reduction <add>, %47, %cst_20 [2] : vector<2x8x8xf32> to vector<2x8xf32>
    %49 = vector.shape_cast %48 : vector<2x8xf32> to vector<2x8x1xf32>
    %50 = tpu.reciprocal %49 {approx = true} : vector<2x8x1xf32> -> vector<2x8x1xf32>
    %51 = vector.broadcast %50 : vector<2x8x1xf32> to vector<2x8x8xf32>
    %52 = arith.mulf %47, %51 : vector<2x8x8xf32>
    "tpu.trace_start"() <{level = 10 : i32, message = "bqk,bkd->bqd"}> : () -> ()
    %cst_21 = arith.constant dense<0.000000e+00> : vector<2x8x16xf32>
    %53 = tpu.matmul %52, %41, %cst_21 {dimension_numbers = #tpu.dot_dimension_numbers<[2], [1], [1], [2], [0, 0, 0, 1, 1, 2], [0], [0]>} : vector<2x8x8xf32>, vector<2x8x16xf32>, vector<2x8x16xf32> -> vector<2x8x16xf32>
    "tpu.trace_stop"() : () -> ()
    %54 = vector.extract_strided_slice %37 {offsets = [0, 0], sizes = [16, 64], strides = [1, 1]} : vector<64x64xf32> to vector<16x64xf32>
    "tpu.trace_start"() <{level = 10 : i32, message = "bqd,df->bqf"}> : () -> ()
    %cst_22 = arith.constant dense<0.000000e+00> : vector<2x8x64xf32>
    %55 = tpu.matmul %53, %54, %cst_22 {dimension_numbers = #tpu.dot_dimension_numbers<[2], [0], [0, 1], [1], [0, 0, 0, 1, 1, 1], [], []>} : vector<2x8x16xf32>, vector<16x64xf32>, vector<2x8x64xf32> -> vector<2x8x64xf32>
    "tpu.trace_stop"() : () -> ()
    %56 = arith.addf %38, %55 : vector<2x8x64xf32>
    %57 = vector.extract_strided_slice %32 {offsets = [0, 0, 16], sizes = [2, 8, 16], strides = [1, 1, 1]} : vector<2x8x64xf32> to vector<2x8x16xf32>
    %58 = vector.extract_strided_slice %34 {offsets = [0, 0, 16], sizes = [2, 8, 16], strides = [1, 1, 1]} : vector<2x8x64xf32> to vector<2x8x16xf32>
    %59 = vector.extract_strided_slice %36 {offsets = [0, 0, 16], sizes = [2, 8, 16], strides = [1, 1, 1]} : vector<2x8x64xf32> to vector<2x8x16xf32>
    "tpu.trace_start"() <{level = 10 : i32, message = "bqd,bkd->bqk"}> : () -> ()
    %cst_23 = arith.constant dense<0.000000e+00> : vector<2x8x8xf32>
    %60 = tpu.matmul %57, %58, %cst_23 {dimension_numbers = #tpu.dot_dimension_numbers<[2], [2], [1], [1], [0, 0, 0, 1, 1, 1], [0], [0]>} : vector<2x8x16xf32>, vector<2x8x16xf32>, vector<2x8x8xf32> -> vector<2x8x8xf32>
    "tpu.trace_stop"() : () -> ()
    %cst_24 = arith.constant dense<0xFF800000> : vector<2x8xf32>
    %61 = vector.multi_reduction <maximumf>, %60, %cst_24 [2] : vector<2x8x8xf32> to vector<2x8xf32>
    %62 = vector.shape_cast %61 : vector<2x8xf32> to vector<2x8x1xf32>
    %63 = vector.broadcast %62 : vector<2x8x1xf32> to vector<2x8x8xf32>
    %64 = arith.subf %60, %63 : vector<2x8x8xf32>
    %65 = math.exp %64 : vector<2x8x8xf32>
    %cst_25 = arith.constant dense<0.000000e+00> : vector<2x8xf32>
    %66 = vector.multi_reduction <add>, %65, %cst_25 [2] : vector<2x8x8xf32> to vector<2x8xf32>
    %67 = vector.shape_cast %66 : vector<2x8xf32> to vector<2x8x1xf32>
    %68 = tpu.reciprocal %67 {approx = true} : vector<2x8x1xf32> -> vector<2x8x1xf32>
    %69 = vector.broadcast %68 : vector<2x8x1xf32> to vector<2x8x8xf32>
    %70 = arith.mulf %65, %69 : vector<2x8x8xf32>
    "tpu.trace_start"() <{level = 10 : i32, message = "bqk,bkd->bqd"}> : () -> ()
    %cst_26 = arith.constant dense<0.000000e+00> : vector<2x8x16xf32>
    %71 = tpu.matmul %70, %59, %cst_26 {dimension_numbers = #tpu.dot_dimension_numbers<[2], [1], [1], [2], [0, 0, 0, 1, 1, 2], [0], [0]>} : vector<2x8x8xf32>, vector<2x8x16xf32>, vector<2x8x16xf32> -> vector<2x8x16xf32>
    "tpu.trace_stop"() : () -> ()
    %72 = vector.extract_strided_slice %37 {offsets = [16, 0], sizes = [16, 64], strides = [1, 1]} : vector<64x64xf32> to vector<16x64xf32>
    "tpu.trace_start"() <{level = 10 : i32, message = "bqd,df->bqf"}> : () -> ()
    %cst_27 = arith.constant dense<0.000000e+00> : vector<2x8x64xf32>
    %73 = tpu.matmul %71, %72, %cst_27 {dimension_numbers = #tpu.dot_dimension_numbers<[2], [0], [0, 1], [1], [0, 0, 0, 1, 1, 1], [], []>} : vector<2x8x16xf32>, vector<16x64xf32>, vector<2x8x64xf32> -> vector<2x8x64xf32>
    "tpu.trace_stop"() : () -> ()
    %74 = arith.addf %56, %73 : vector<2x8x64xf32>
    %75 = vector.extract_strided_slice %32 {offsets = [0, 0, 32], sizes = [2, 8, 16], strides = [1, 1, 1]} : vector<2x8x64xf32> to vector<2x8x16xf32>
    %76 = vector.extract_strided_slice %34 {offsets = [0, 0, 32], sizes = [2, 8, 16], strides = [1, 1, 1]} : vector<2x8x64xf32> to vector<2x8x16xf32>
    %77 = vector.extract_strided_slice %36 {offsets = [0, 0, 32], sizes = [2, 8, 16], strides = [1, 1, 1]} : vector<2x8x64xf32> to vector<2x8x16xf32>
    "tpu.trace_start"() <{level = 10 : i32, message = "bqd,bkd->bqk"}> : () -> ()
    %cst_28 = arith.constant dense<0.000000e+00> : vector<2x8x8xf32>
    %78 = tpu.matmul %75, %76, %cst_28 {dimension_numbers = #tpu.dot_dimension_numbers<[2], [2], [1], [1], [0, 0, 0, 1, 1, 1], [0], [0]>} : vector<2x8x16xf32>, vector<2x8x16xf32>, vector<2x8x8xf32> -> vector<2x8x8xf32>
    "tpu.trace_stop"() : () -> ()
    %cst_29 = arith.constant dense<0xFF800000> : vector<2x8xf32>
    %79 = vector.multi_reduction <maximumf>, %78, %cst_29 [2] : vector<2x8x8xf32> to vector<2x8xf32>
    %80 = vector.shape_cast %79 : vector<2x8xf32> to vector<2x8x1xf32>
    %81 = vector.broadcast %80 : vector<2x8x1xf32> to vector<2x8x8xf32>
    %82 = arith.subf %78, %81 : vector<2x8x8xf32>
    %83 = math.exp %82 : vector<2x8x8xf32>
    %cst_30 = arith.constant dense<0.000000e+00> : vector<2x8xf32>
    %84 = vector.multi_reduction <add>, %83, %cst_30 [2] : vector<2x8x8xf32> to vector<2x8xf32>
    %85 = vector.shape_cast %84 : vector<2x8xf32> to vector<2x8x1xf32>
    %86 = tpu.reciprocal %85 {approx = true} : vector<2x8x1xf32> -> vector<2x8x1xf32>
    %87 = vector.broadcast %86 : vector<2x8x1xf32> to vector<2x8x8xf32>
    %88 = arith.mulf %83, %87 : vector<2x8x8xf32>
    "tpu.trace_start"() <{level = 10 : i32, message = "bqk,bkd->bqd"}> : () -> ()
    %cst_31 = arith.constant dense<0.000000e+00> : vector<2x8x16xf32>
    %89 = tpu.matmul %88, %77, %cst_31 {dimension_numbers = #tpu.dot_dimension_numbers<[2], [1], [1], [2], [0, 0, 0, 1, 1, 2], [0], [0]>} : vector<2x8x8xf32>, vector<2x8x16xf32>, vector<2x8x16xf32> -> vector<2x8x16xf32>
    "tpu.trace_stop"() : () -> ()
    %90 = vector.extract_strided_slice %37 {offsets = [32, 0], sizes = [16, 64], strides = [1, 1]} : vector<64x64xf32> to vector<16x64xf32>
    "tpu.trace_start"() <{level = 10 : i32, message = "bqd,df->bqf"}> : () -> ()
    %cst_32 = arith.constant dense<0.000000e+00> : vector<2x8x64xf32>
    %91 = tpu.matmul %89, %90, %cst_32 {dimension_numbers = #tpu.dot_dimension_numbers<[2], [0], [0, 1], [1], [0, 0, 0, 1, 1, 1], [], []>} : vector<2x8x16xf32>, vector<16x64xf32>, vector<2x8x64xf32> -> vector<2x8x64xf32>
    "tpu.trace_stop"() : () -> ()
    %92 = arith.addf %74, %91 : vector<2x8x64xf32>
    %93 = vector.extract_strided_slice %32 {offsets = [0, 0, 48], sizes = [2, 8, 16], strides = [1, 1, 1]} : vector<2x8x64xf32> to vector<2x8x16xf32>
    %94 = vector.extract_strided_slice %34 {offsets = [0, 0, 48], sizes = [2, 8, 16], strides = [1, 1, 1]} : vector<2x8x64xf32> to vector<2x8x16xf32>
    %95 = vector.extract_strided_slice %36 {offsets = [0, 0, 48], sizes = [2, 8, 16], strides = [1, 1, 1]} : vector<2x8x64xf32> to vector<2x8x16xf32>
    "tpu.trace_start"() <{level = 10 : i32, message = "bqd,bkd->bqk"}> : () -> ()
    %cst_33 = arith.constant dense<0.000000e+00> : vector<2x8x8xf32>
    %96 = tpu.matmul %93, %94, %cst_33 {dimension_numbers = #tpu.dot_dimension_numbers<[2], [2], [1], [1], [0, 0, 0, 1, 1, 1], [0], [0]>} : vector<2x8x16xf32>, vector<2x8x16xf32>, vector<2x8x8xf32> -> vector<2x8x8xf32>
    "tpu.trace_stop"() : () -> ()
    %cst_34 = arith.constant dense<0xFF800000> : vector<2x8xf32>
    %97 = vector.multi_reduction <maximumf>, %96, %cst_34 [2] : vector<2x8x8xf32> to vector<2x8xf32>
    %98 = vector.shape_cast %97 : vector<2x8xf32> to vector<2x8x1xf32>
    %99 = vector.broadcast %98 : vector<2x8x1xf32> to vector<2x8x8xf32>
    %100 = arith.subf %96, %99 : vector<2x8x8xf32>
    %101 = math.exp %100 : vector<2x8x8xf32>
    %cst_35 = arith.constant dense<0.000000e+00> : vector<2x8xf32>
    %102 = vector.multi_reduction <add>, %101, %cst_35 [2] : vector<2x8x8xf32> to vector<2x8xf32>
    %103 = vector.shape_cast %102 : vector<2x8xf32> to vector<2x8x1xf32>
    %104 = tpu.reciprocal %103 {approx = true} : vector<2x8x1xf32> -> vector<2x8x1xf32>
    %105 = vector.broadcast %104 : vector<2x8x1xf32> to vector<2x8x8xf32>
    %106 = arith.mulf %101, %105 : vector<2x8x8xf32>
    "tpu.trace_start"() <{level = 10 : i32, message = "bqk,bkd->bqd"}> : () -> ()
    %cst_36 = arith.constant dense<0.000000e+00> : vector<2x8x16xf32>
    %107 = tpu.matmul %106, %95, %cst_36 {dimension_numbers = #tpu.dot_dimension_numbers<[2], [1], [1], [2], [0, 0, 0, 1, 1, 2], [0], [0]>} : vector<2x8x8xf32>, vector<2x8x16xf32>, vector<2x8x16xf32> -> vector<2x8x16xf32>
    "tpu.trace_stop"() : () -> ()
    %108 = vector.extract_strided_slice %37 {offsets = [48, 0], sizes = [16, 64], strides = [1, 1]} : vector<64x64xf32> to vector<16x64xf32>
    "tpu.trace_start"() <{level = 10 : i32, message = "bqd,df->bqf"}> : () -> ()
    %cst_37 = arith.constant dense<0.000000e+00> : vector<2x8x64xf32>
    %109 = tpu.matmul %107, %108, %cst_37 {dimension_numbers = #tpu.dot_dimension_numbers<[2], [0], [0, 1], [1], [0, 0, 0, 1, 1, 1], [], []>} : vector<2x8x16xf32>, vector<16x64xf32>, vector<2x8x64xf32> -> vector<2x8x64xf32>
    "tpu.trace_stop"() : () -> ()
    %110 = arith.addf %92, %109 : vector<2x8x64xf32>
    %111 = vector.shape_cast %110 : vector<2x8x64xf32> to vector<16x64xf32>
    %c0_38 = arith.constant 0 : index
    %c0_39 = arith.constant 0 : index
    %112 = vector.load %arg7[%c0_38, %c0_39] : memref<1x64xf32, #tpu.memory_space<vmem>>, vector<1x64xf32>
    %113 = vector.broadcast %112 : vector<1x64xf32> to vector<16x64xf32>
    %114 = arith.addf %111, %113 : vector<16x64xf32>
    %115 = arith.addf %1, %114 : vector<16x64xf32>
    %c0_40 = arith.constant 0 : index
    %c0_41 = arith.constant 0 : index
    %116 = vector.load %arg8[%c0_40, %c0_41] : memref<1x64xf32, #tpu.memory_space<vmem>>, vector<1x64xf32>
    %c0_42 = arith.constant 0 : index
    %c0_43 = arith.constant 0 : index
    %117 = vector.load %arg9[%c0_42, %c0_43] : memref<1x64xf32, #tpu.memory_space<vmem>>, vector<1x64xf32>
    %cst_44 = arith.constant dense<0.000000e+00> : vector<16xf32>
    %118 = vector.multi_reduction <add>, %115, %cst_44 [1] : vector<16x64xf32> to vector<16xf32>
    %119 = vector.shape_cast %118 : vector<16xf32> to vector<16x1xf32>
    %cst_45 = arith.constant 6.400000e+01 : f32
    %120 = vector.broadcast %cst_45 : f32 to vector<16x1xf32>
    %121 = arith.divf %119, %120 : vector<16x1xf32>
    %122 = vector.broadcast %121 : vector<16x1xf32> to vector<16x64xf32>
    %123 = arith.subf %115, %122 : vector<16x64xf32>
    %124 = arith.mulf %123, %123 : vector<16x64xf32>
    %cst_46 = arith.constant dense<0.000000e+00> : vector<16xf32>
    %125 = vector.multi_reduction <add>, %124, %cst_46 [1] : vector<16x64xf32> to vector<16xf32>
    %126 = vector.shape_cast %125 : vector<16xf32> to vector<16x1xf32>
    %cst_47 = arith.constant 6.400000e+01 : f32
    %127 = vector.broadcast %cst_47 : f32 to vector<16x1xf32>
    %128 = arith.divf %126, %127 : vector<16x1xf32>
    %cst_48 = arith.constant 9.99999974E-6 : f32
    %129 = vector.broadcast %cst_48 : f32 to vector<16x1xf32>
    %130 = arith.addf %128, %129 : vector<16x1xf32>
    %131 = math.rsqrt %130 : vector<16x1xf32>
    %132 = vector.broadcast %121 : vector<16x1xf32> to vector<16x64xf32>
    %133 = arith.subf %115, %132 : vector<16x64xf32>
    %134 = vector.broadcast %131 : vector<16x1xf32> to vector<16x64xf32>
    %135 = arith.mulf %133, %134 : vector<16x64xf32>
    %136 = vector.broadcast %116 : vector<1x64xf32> to vector<16x64xf32>
    %137 = arith.mulf %135, %136 : vector<16x64xf32>
    %138 = vector.broadcast %117 : vector<1x64xf32> to vector<16x64xf32>
    %139 = arith.addf %137, %138 : vector<16x64xf32>
    %c0_49 = arith.constant 0 : index
    %c0_50 = arith.constant 0 : index
    %140 = vector.load %arg10[%c0_49, %c0_50] : memref<64x256xf32, #tpu.memory_space<vmem>>, vector<64x256xf32>
    %cst_51 = arith.constant dense<0.000000e+00> : vector<16x256xf32>
    %141 = tpu.matmul %139, %140, %cst_51 {dimension_numbers = #tpu.dot_dimension_numbers<[1], [0], [0], [1], [0, 0, 1, 1], [], []>} : vector<16x64xf32>, vector<64x256xf32>, vector<16x256xf32> -> vector<16x256xf32>
    %c0_52 = arith.constant 0 : index
    %c0_53 = arith.constant 0 : index
    %142 = vector.load %arg11[%c0_52, %c0_53] : memref<1x256xf32, #tpu.memory_space<vmem>>, vector<1x256xf32>
    %143 = vector.broadcast %142 : vector<1x256xf32> to vector<16x256xf32>
    %144 = arith.addf %141, %143 : vector<16x256xf32>
    %cst_54 = arith.constant 0.000000e+00 : f32
    %145 = vector.broadcast %cst_54 : f32 to vector<16x256xf32>
    %146 = arith.maximumf %144, %145 : vector<16x256xf32>
    %c0_55 = arith.constant 0 : index
    %c0_56 = arith.constant 0 : index
    %147 = vector.load %arg12[%c0_55, %c0_56] : memref<256x64xf32, #tpu.memory_space<vmem>>, vector<256x64xf32>
    %cst_57 = arith.constant dense<0.000000e+00> : vector<16x64xf32>
    %148 = tpu.matmul %146, %147, %cst_57 {dimension_numbers = #tpu.dot_dimension_numbers<[1], [0], [0], [1], [0, 0, 1, 1], [], []>} : vector<16x256xf32>, vector<256x64xf32>, vector<16x64xf32> -> vector<16x64xf32>
    %c0_58 = arith.constant 0 : index
    %c0_59 = arith.constant 0 : index
    %149 = vector.load %arg13[%c0_58, %c0_59] : memref<1x64xf32, #tpu.memory_space<vmem>>, vector<1x64xf32>
    %150 = vector.broadcast %149 : vector<1x64xf32> to vector<16x64xf32>
    %151 = arith.addf %148, %150 : vector<16x64xf32>
    %152 = arith.addf %151, %115 : vector<16x64xf32>
    %153 = vector.shape_cast %152 : vector<16x64xf32> to vector<2x8x64xf32>
    %c0_60 = arith.constant 0 : index
    %c0_61 = arith.constant 0 : index
    %c0_62 = arith.constant 0 : index
    %154 = vector.load %arg14[%c0_60, %c0_61, %c0_62] : memref<2x8x64xf32, #tpu.memory_space<vmem>>, vector<2x8x64xf32>
    tpu.vector_store %arg14[%c0_60, %c0_61, %c0_62], %153 {strides = array<i32>} : memref<2x8x64xf32, #tpu.memory_space<vmem>>, vector<2x8x64xf32>,
    return
  }
  func.func @transform_0(%arg0: i32) -> (i32, i32, i32) {
    %c0_i32 = arith.constant 0 : i32
    %c0_i32_0 = arith.constant 0 : i32
    %c0_i32_1 = arith.constant 0 : i32
    return %arg0, %c0_i32, %c0_i32_0 : i32, i32, i32
  }
  func.func @transform_1(%arg0: i32) -> (i32, i32) {
    %c0_i32 = arith.constant 0 : i32
    %c0_i32_0 = arith.constant 0 : i32
    %c0_i32_1 = arith.constant 0 : i32
    return %c0_i32, %c0_i32_0 : i32, i32
  }
  func.func @transform_2(%arg0: i32) -> (i32, i32) {
    %c0_i32 = arith.constant 0 : i32
    %c0_i32_0 = arith.constant 0 : i32
    %c0_i32_1 = arith.constant 0 : i32
    return %c0_i32, %c0_i32_0 : i32, i32
  }
  func.func @transform_3(%arg0: i32) -> (i32, i32) {
    %c0_i32 = arith.constant 0 : i32
    %c0_i32_0 = arith.constant 0 : i32
    %c0_i32_1 = arith.constant 0 : i32
    return %c0_i32, %c0_i32_0 : i32, i32
  }
  func.func @transform_4(%arg0: i32) -> (i32, i32) {
    %c0_i32 = arith.constant 0 : i32
    %c0_i32_0 = arith.constant 0 : i32
    %c0_i32_1 = arith.constant 0 : i32
    return %c0_i32, %c0_i32_0 : i32, i32
  }
  func.func @transform_5(%arg0: i32) -> (i32, i32) {
    %c0_i32 = arith.constant 0 : i32
    %c0_i32_0 = arith.constant 0 : i32
    %c0_i32_1 = arith.constant 0 : i32
    return %c0_i32, %c0_i32_0 : i32, i32
  }
  func.func @transform_6(%arg0: i32) -> (i32, i32) {
    %c0_i32 = arith.constant 0 : i32
    %c0_i32_0 = arith.constant 0 : i32
    %c0_i32_1 = arith.constant 0 : i32
    return %c0_i32, %c0_i32_0 : i32, i32
  }
  func.func @transform_7(%arg0: i32) -> (i32, i32) {
    %c0_i32 = arith.constant 0 : i32
    %c0_i32_0 = arith.constant 0 : i32
    %c0_i32_1 = arith.constant 0 : i32
    return %c0_i32, %c0_i32_0 : i32, i32
  }
  func.func @transform_8(%arg0: i32) -> (i32, i32) {
    %c0_i32 = arith.constant 0 : i32
    %c0_i32_0 = arith.constant 0 : i32
    %c0_i32_1 = arith.constant 0 : i32
    return %c0_i32, %c0_i32_0 : i32, i32
  }
  func.func @transform_9(%arg0: i32) -> (i32, i32) {
    %c0_i32 = arith.constant 0 : i32
    %c0_i32_0 = arith.constant 0 : i32
    %c0_i32_1 = arith.constant 0 : i32
    return %c0_i32, %c0_i32_0 : i32, i32
  }
  func.func @transform_10(%arg0: i32) -> (i32, i32) {
    %c0_i32 = arith.constant 0 : i32
    %c0_i32_0 = arith.constant 0 : i32
    %c0_i32_1 = arith.constant 0 : i32
    return %c0_i32, %c0_i32_0 : i32, i32
  }
  func.func @transform_11(%arg0: i32) -> (i32, i32) {
    %c0_i32 = arith.constant 0 : i32
    %c0_i32_0 = arith.constant 0 : i32
    %c0_i32_1 = arith.constant 0 : i32
    return %c0_i32, %c0_i32_0 : i32, i32
  }
  func.func @transform_12(%arg0: i32) -> (i32, i32) {
    %c0_i32 = arith.constant 0 : i32
    %c0_i32_0 = arith.constant 0 : i32
    %c0_i32_1 = arith.constant 0 : i32
    return %c0_i32, %c0_i32_0 : i32, i32
  }
  func.func @transform_13(%arg0: i32) -> (i32, i32, i32) {
    %c0_i32 = arith.constant 0 : i32
    %c0_i32_0 = arith.constant 0 : i32
    %c0_i32_1 = arith.constant 0 : i32
    return %arg0, %c0_i32, %c0_i32_0 : i32, i32, i32
  }
}

</mosaic_0001>

<bundles_post_ra>
// kernel: tpu_custom_call.1
= control target key start
LH: loop header
LB: loop body
LE: loop exit
PB: predicated region body
PF: predicated region fallthrough
CT: control target
= control target key end

     0   :  { %vm49_vm0 = vcmask 523264   ;;  %s1711_s0 = inlined_call_operand.vmem [shape: f32[2,8,64], index: 0, kind: input, shape index: {}]   ;;  %s1712_s1 = inlined_call_operand.vmem [shape: f32[1,64], index: 1, kind: input, shape index: {}]   ;;  %s1713_s2 = inlined_call_operand.vmem [shape: f32[1,64], index: 2, kind: input, shape index: {}]   ;;  %s1714_s3 = inlined_call_operand.vmem [shape: f32[64,192], index: 3, kind: input, shape index: {}]   ;;  %s1715_s4 = inlined_call_operand.vmem [shape: f32[1,192], index: 4, kind: input, shape index: {}]   ;;  %s1716_s5 = inlined_call_operand.vmem [shape: f32[64,64], index: 5, kind: input, shape index: {}]   ;;  %s1717_s6 = inlined_call_operand.vmem [shape: f32[1,64], index: 6, kind: input, shape index: {}]   ;;  %s1718_s7 = inlined_call_operand.vmem [shape: f32[1,64], index: 7, kind: input, shape index: {}]   ;;  %s1719_s8 = inlined_call_operand.vmem [shape: f32[1,64], index: 8, kind: input, shape index: {}]   ;;  %s1720_s9 = inlined_call_operand.vmem [shape: f32[64,256], index: 9, kind: input, shape index: {}]   ;;  %s1721_s10 = inlined_call_operand.vmem [shape: f32[1,256], index: 10, kind: input, shape index: {}]   ;;  %s1722_s11 = inlined_call_operand.vmem [shape: f32[256,64], index: 11, kind: input, shape index: {}]   ;;  %s1723_s12 = inlined_call_operand.vmem [shape: f32[1,64], index: 12, kind: input, shape index: {}]   ;;  %s1724_s13 = inlined_call_operand.hbm [shape: f32[2,8,64], index: 13, kind: output, shape index: {}]  }
   0x1   :  { %v1286_v0 = vld [vmem:[%s1711_s0] sm:$0xff] }
   0x2   :  { %v50_v1 = vsel %vm49_vm0, %v1286_v0, 0.0 }
   0x3   :  { %51 = vadd.xlane.f32.xlu0 %v50_v1 }
   0x4   :  { %18 = vsyncpa [#allocation3], 0  ;;  %v1293_v2 = vld [vmem:[%s1711_s0 + $0x8] sm:$0xff]  ;;  %v1202_v4 = vmov 64.0   ;;  %v125_v21 = vld [vmem:[%s1714_s3 + $0x70] sm:$0xff]  ;;  %s1203_s28 = smov 112  }
   0x5   :  { %v53_v3 = vsel %vm49_vm0, %v1293_v2, 0.0  ;;  %1134 = vrcp.f32 %v1202_v4  ;;  %v126_v22 = vld [vmem:[%s1714_s3 + $0x78] sm:$0xff]  ;;  %147 = vmatpush.msra.mxu0 %v125_v21  ;;  %v123_v23 = vld [vmem:[%s1714_s3 + $0x60] sm:$0xff]  ;;  %v124_v24 = vld [vmem:[%s1714_s3 + $0x68] sm:$0xff]  ;;  %s1204_s0 = smov 64   ;;  %s1205_s29 = smov 48  }
   0x6   :  { %170 = vmatpush.msra.mxu1 %v126_v22  ;;  %v121_v25 = vld [vmem:[%s1714_s3 + $0x50] sm:$0xff]  ;;  %v122_v26 = vld [vmem:[%s1714_s3 + $0x58] sm:$0xff]  ;;  %v119_v27 = vld [vmem:[%s1714_s3 + $0x40] sm:$0xff]  ;;  %vm196_vm8 = vcmask 130048   ;;  %vm248_vm9 = vcmask 64512   ;;  %s1207_s30 = smov 96  }
   0x7   :  { %148 = vmatpush.msra.mxu0 %v123_v23  ;;  %v120_v28 = vld [vmem:[%s1714_s3 + $0x48] sm:$0xff]  ;;  %v117_v29 = vld [vmem:[%s1714_s3 + $0x30] sm:$0xff]  ;;  %v118_v30 = vld [vmem:[%s1714_s3 + $0x38] sm:$0xff]  ;;  %s1208_s14 = smov 16   ;;  %s1209_s15 = smov 80  }
   0x8   :  { %171 = vmatpush.msra.mxu1 %v124_v24  ;;  %v115_v31 = vld [vmem:[%s1714_s3 + $0x20] sm:$0xff]  ;;  %v116_v32 = vld [vmem:[%s1714_s3 + $0x28] sm:$0xff]  ;;  %v113_v33 = vld [vmem:[%s1714_s3 + $0x10] sm:$0xff] }
   0x9   :  { %149 = vmatpush.msra.mxu0 %v121_v25  ;;  %v114_v34 = vld [vmem:[%s1714_s3 + $0x18] sm:$0xff]  ;;  %v111_v35 = vld [vmem:[%s1714_s3] sm:$0xff]  ;;  %v112_v36 = vld [vmem:[%s1714_s3 + $0x8] sm:$0xff] }
   0xa   :  { %172 = vmatpush.msra.mxu1 %v122_v26  ;;  %v1128_v51 = vld [vmem:[%s1712_s1] ss:$0 sm:$0xff] }
   0xb   :  { %54 = vadd.xlane.f32.xlu0 %v53_v3  ;;  %v1135_v5 = vpop.eup %1134  ;;  %150 = vmatpush.msra.mxu0 %v119_v27  ;;  %v1129_v55 = vld [vmem:[%s1713_s2] ss:$0 sm:$0xff] }
   0xc   :  { %v57_v6 = vmul.f32 64.0, %v1135_v5  ;;  %vm61_vm1 = vweird.f32 %v1135_v5  ;;  %173 = vmatpush.msra.mxu1 %v120_v28  ;;  %v127_v3 = vld [vmem:[%s1715_s4] sm:$0x3]  ;;  %s1206_s4 = smov 32  }
   0xd   :  { %151 = vmatpush.msra.mxu0 %v117_v29  ;;  %v129_v4 = vperm.slane %v127_v3, 0 }
   0xe   :  { %v58_v7 = vsub.f32 1.0, %v57_v6  ;;  %174 = vmatpush.msra.mxu1 %v118_v30 }
   0xf   :  { %152 = vmatpush.msra.mxu0 %v115_v31 }
  0x10   :  { %v59_v8 = vmul.f32 %v1135_v5, %v58_v7  ;;  %175 = vmatpush.msra.mxu1 %v116_v32 }
  0x11   :  { %153 = vmatpush.msra.mxu0 %v113_v33 }
  0x12   :  { %v60_v9 = vadd.f32 %v1135_v5, %v59_v8  ;;  %176 = vmatpush.msra.mxu1 %v114_v34 }
  0x13   :  { %154 = vmatpush.msra.mxu0 %v111_v35 }
  0x14   :  { %v1297_v10 = vsel %vm61_vm1, %v1135_v5, %v60_v9  ;;  %177 = vmatpush.msra.mxu1 %v112_v36 }
  0x76   :  { %v52_v11 = vpop.xlane.xlu0 %51 }
  0x77   :  { %v63_v12 = vmul.f32 %v1297_v10, %v52_v11 }
  0x79   :  { %v1301_v13 = vsub.f32 %v1286_v0, %v63_v12  ;;  %v130_v12 = vperm.slane %v127_v3, 1 }
  0x7b   :  { %v67_v14 = vmul.f32 %v1301_v13, %v1301_v13 }
  0x7d   :  { %v69_v15 = vsel %vm49_vm0, %v67_v14, 0.0 }
  0x7e   :  { %70 = vadd.xlane.f32.xlu1 %v69_v15  ;;  %v55_v16 = vpop.xlane.xlu0 %54 }
  0x7f   :  { %v64_v17 = vmul.f32 %v1297_v10, %v55_v16 }
  0x81   :  { %v1308_v18 = vsub.f32 %v1293_v2, %v64_v17 }
  0x83   :  { %v68_v19 = vmul.f32 %v1308_v18, %v1308_v18 }
  0x85   :  { %v72_v20 = vsel %vm49_vm0, %v68_v19, 0.0 }
  0x86   :  { %73 = vadd.xlane.f32.xlu1 %v72_v20 }
  0xf1   :  { %v71_v37 = vpop.xlane.xlu1 %70 }
  0xf2   :  { %v75_v38 = vmul.f32 %v71_v37, %v1297_v10 }
  0xf4   :  { %v77_v39 = vadd.f32 1e-05, %v75_v38 }
  0xf6   :  { %1136 = vrsqrt.f32 %v77_v39  ;;  %vm85_vm3 = vweird.f32 %v77_v39 }
  0xf9   :  { %v74_v40 = vpop.xlane.xlu1 %73 }
  0xfa   :  { %v76_v41 = vmul.f32 %v74_v40, %v1297_v10 }
  0xfc   :  { %v1137_v42 = vpop.eup %1136  ;;  %v78_v43 = vadd.f32 1e-05, %v76_v41 }
  0xfd   :  { %v80_v44 = vmul.f32 %v1137_v42, %v77_v39  ;;  %vm86_vm2 = vweird.f32 %v1137_v42 }
  0xfe   :  { %1138 = vrsqrt.f32 %v78_v43  ;;  %vm87_vm4 = vmor %vm85_vm3, %vm86_vm2  ;;  %vm95_vm6 = vweird.f32 %v78_v43 }
  0xff   :  { %v81_v45 = vmul.f32 %v1137_v42, %v80_v44 }
 0x101   :  { %v82_v46 = vmul.f32 0.5, %v81_v45 }
 0x103   :  { %v83_v47 = vsub.f32 1.5, %v82_v46  ;;  %v1430_v46 = vld [vmem:[%s1716_s5 + $0x8] sm:$0xff] }
 0x104   :  { %v1139_v48 = vpop.eup %1138  ;;  %498 = vmatpush.msrb.mxu1 %v1430_v46 }
 0x105   :  { %v84_v49 = vmul.f32 %v1137_v42, %v83_v47  ;;  %v90_v50 = vmul.f32 %v1139_v48, %v78_v43  ;;  %vm96_vm5 = vweird.f32 %v1139_v48  ;;  %v1435_v47 = vld [vmem:[%s1716_s5] sm:$0xff] }
 0x106   :  { %vm97_vm7 = vmor %vm95_vm6, %vm96_vm5  ;;  %499 = vmatpush.msrb.mxu1 %v1435_v47 }
 0x107   :  { %v88_v52 = vsel %vm87_vm4, %v1137_v42, %v84_v49  ;;  %v91_v53 = vmul.f32 %v1139_v48, %v90_v50 }
 0x108   :  { %v99_v54 = vmul.f32 %v88_v52, %v1301_v13 }
 0x109   :  { %v92_v56 = vmul.f32 0.5, %v91_v53 }
 0x10a   :  { %v104_v57 = vmul.f32 %v1128_v51, %v99_v54 }
 0x10b   :  { %v93_v58 = vsub.f32 1.5, %v92_v56 }
 0x10c   :  { %v109_v59 = vadd.f32 %v1129_v55, %v104_v57 }
 0x10d   :  { %v94_v60 = vmul.f32 %v1139_v48, %v93_v58 }
 0x10e   :  { %1075 = vmatmul.msk.f32.vlgmr.msra.gmra.mxu0 %vm49_vm0, %v109_v59  ;;  %1077 = vmatmul.msk.f32.vlgmr.msra.gmra.mxu1 %vm49_vm0, %v109_v59 }
 0x10f   :  { %v98_v61 = vsel %vm97_vm7, %v1139_v48, %v94_v60 }
 0x110   :  { %v100_v62 = vmul.f32 %v98_v61, %v1308_v18  ;;  %v188_v61 = vld [vmem:[%s1716_s5 + $0x18] sm:$0xff] }
 0x112   :  { %v105_v63 = vmul.f32 %v1128_v51, %v100_v62  ;;  %v187_v62 = vld [vmem:[%s1716_s5 + $0x10] sm:$0xff] }
 0x114   :  { %v110_v1 = vadd.f32 %v1129_v55, %v105_v63 }
 0x116   :  { %1076 = vmatmul.msk.f32.gmra.mxu0 %vm49_vm0, %v110_v1  ;;  %1078 = vmatmul.msk.f32.gmra.mxu1 %vm49_vm0, %v110_v1 }
 0x18b   :  { %v156_v5 = vpop.f32.mrf.mxu0  ;;  %v179_v9 = vpop.f32.mrf.mxu1 }
 0x18c   :  { %v1378_v6 = vadd.f32 %v156_v5, %v129_v4  ;;  %v1394_v16 = vadd.f32 %v179_v9, %v130_v12 }
 0x18e   :  { %317 = vrot.lane.b32.xlu0 %v1378_v6, %s1203_s28  ;;  %194 = vrot.lane.b32.xlu1 %v1378_v6, %s1204_s0 }
 0x193   :  { %v159_v7 = vpop.f32.mrf.mxu0  ;;  %v182_v11 = vpop.f32.mrf.mxu1 }
 0x194   :  { %v1383_v8 = vadd.f32 %v159_v7, %v129_v4  ;;  %v1387_v13 = vadd.f32 %v182_v11, %v130_v12 }
 0x196   :  { %222 = vrot.lane.b32.xlu2 %v1383_v8, %s1204_s0 }
 0x19e   :  { %319 = vrot.lane.b32.xlu2 %v1378_v6, %s1205_s29 }
 0x1f0   :  { %v223_v14 = vpop.permute.xlu2 %222 }
 0x1f1   :  { %1081 = vmatpush.xpose.msk.msra.mxu3 %vm196_vm8, %v223_v14 }
 0x1f4   :  { %1082 = vmatmul.msk.f32.vlgmr.msra.gmra.mxu3 %vm196_vm8, %v1383_v8 }
 0x1f5   :  { %312 = vmatpush.msrb.mxu3 %v1387_v13 }
 0x1f8   :  { %v320_v15 = vpop.permute.xlu2 %319 }
 0x1f9   :  { %1085 = vmatpush.xpose.msk.msra.mxu2 %vm196_vm8, %v320_v15 }
 0x200   :  { %v195_v17 = vpop.permute.xlu1 %194  ;;  %v318_v18 = vpop.permute.xlu0 %317 }
 0x201   :  { %1079 = vmatpush.xpose.msk.msrb.mxu0 %vm196_vm8, %v195_v17  ;;  %1086 = vmatmul.msk.f32.vlgmr.msra.gmra.mxu2 %vm196_vm8, %v318_v18 }
 0x204   :  { %1080 = vmatmul.msk.f32.vlgmr.msrb.gmra.mxu0 %vm196_vm8, %v1378_v6 }
 0x205   :  { %289 = vmatpush.msra.mxu0 %v1394_v16 }
 0x207   :  { %469 = vmatpush.msrb.mxu0 %v188_v61 }
 0x209   :  { %470 = vmatpush.msrb.mxu0 %v187_v62 }
 0x277   :  { %v245_v19 = vpop.f32.mrf.mxu3 }
 0x278   :  { %v252_v20 = vsel %vm248_vm9, %v245_v19, -inf }
 0x279   :  { %253 = vmax.xlane.f32.xlu2 %v252_v20 }
 0x281   :  { %v218_v34 = vpop.f32.mrf.mxu0 }
 0x282   :  { %v249_v35 = vsel %vm248_vm9, %v218_v34, -inf }
 0x284   :  { %v342_v21 = vpop.f32.mrf.mxu2 }
 0x285   :  { %v373_v22 = vsel %vm248_vm9, %v342_v21, -inf }
 0x286   :  { %374 = vmax.xlane.f32.xlu0 %v373_v22 }
 0x291   :  { %347 = vrot.lane.b32.xlu2 %v1383_v8, %s1205_s29 }
 0x29a   :  { %345 = vrot.lane.b32.xlu0 %v1383_v8, %s1203_s28 }
 0x2a2   :  { %509 = vrot.lane.b32.xlu0 %v1378_v6, %s1206_s4 }
 0x2aa   :  { %507 = vrot.lane.b32.xlu0 %v1378_v6, %s1207_s30 }
 0x2ec   :  { %v254_v23 = vpop.xlane.xlu2 %253 }
 0x2ed   :  { %v256_v24 = vsub.f32 %v245_v19, %v254_v23 }
 0x2ef   :  { %v259_v25 = vmul.f32 1.442695, %v256_v24 }
 0x2f1   :  { %1140 = vpow2.f32 %v259_v25 }
 0x2f4   :  { %v348_v26 = vpop.permute.xlu2 %347 }
 0x2f5   :  { %1087 = vmatpush.xpose.msk.msra.mxu3 %vm196_vm8, %v348_v26 }
 0x2f7   :  { %v1141_v27 = vpop.eup %1140 }
 0x2f8   :  { %v264_v28 = vsel %vm248_vm9, %v1141_v27, 0.0 }
 0x2f9   :  { %265 = vadd.xlane.f32.xlu1 %v264_v28  ;;  %v375_v29 = vpop.xlane.xlu0 %374 }
 0x2fa   :  { %v379_v30 = vsub.f32 %v342_v21, %v375_v29 }
 0x2fc   :  { %v381_v31 = vmul.f32 1.442695, %v379_v30 }
 0x2fe   :  { %1142 = vpow2.f32 %v381_v31 }
 0x304   :  { %v1143_v32 = vpop.eup %1142 }
 0x305   :  { %v385_v33 = vsel %vm248_vm9, %v1143_v32, 0.0 }
 0x306   :  { %386 = vadd.xlane.f32.xlu2 %v385_v33 }
 0x30c   :  { %v346_v39 = vpop.permute.xlu0 %345 }
 0x312   :  { %396 = vrot.lane.b32.xlu1 %v1394_v16, %s1203_s28 }
 0x314   :  { %v510_v42 = vpop.permute.xlu0 %509 }
 0x31c   :  { %v508_v45 = vpop.permute.xlu0 %507 }
 0x33c   :  { %250 = vmax.xlane.f32.xlu1 %v249_v35 }
 0x355   :  { %537 = vrot.lane.b32.xlu1 %v1383_v8, %s1206_s4  ;;  %s1212_s4 = smov 8  }
 0x35d   :  { %670 = vrot.lane.b32.xlu1 %v1378_v6, %s1208_s14 }
 0x365   :  { %668 = vrot.lane.b32.xlu1 %v1378_v6, %s1209_s15 }
 0x36c   :  { %v266_v36 = vpop.xlane.xlu1 %265 }
 0x36d   :  { %1144 = vrcp.f32 %v266_v36  ;;  %696 = vrot.lane.b32.xlu1 %v1383_v8, %s1209_s15 }
 0x373   :  { %v1145_v37 = vpop.eup %1144 }
 0x374   :  { %v270_v38 = vmul.f32 %v1145_v37, %v1141_v27  ;;  %v190_v37 = vld [vmem:[%s1716_s5 + $0x28] sm:$0xff] }
 0x376   :  { %1084 = vmatmul.msk.f32.vlgmr.msrb.gmra.mxu3 %vm248_vm9, %v270_v38  ;;  %v189_v38 = vld [vmem:[%s1716_s5 + $0x20] sm:$0xff] }
 0x379   :  { %v387_v40 = vpop.xlane.xlu2 %386 }
 0x37a   :  { %1146 = vrcp.f32 %v387_v40 }
 0x37e   :  { %1088 = vmatmul.msk.f32.vlgmr.msra.gmra.mxu3 %vm196_vm8, %v346_v39 }
 0x380   :  { %v1147_v41 = vpop.eup %1146 }
 0x381   :  { %v393_v44 = vmul.f32 %v1147_v41, %v1143_v32 }
 0x384   :  { %v397_v43 = vpop.permute.xlu1 %396 }
 0x385   :  { %417 = vmatpush.msrb.mxu2 %v397_v43 }
 0x386   :  { %1089 = vmatmul.msk.f32.vlgmr.msrb.gmra.mxu2 %vm248_vm9, %v393_v44 }
 0x387   :  { %1095 = vmatpush.xpose.msk.msra.mxu2 %vm196_vm8, %v510_v42 }
 0x38e   :  { %1096 = vmatmul.msk.f32.vlgmr.msra.gmra.mxu2 %vm196_vm8, %v508_v45 }
 0x3af   :  { %v251_v48 = vpop.xlane.xlu1 %250 }
 0x3b0   :  { %v255_v49 = vsub.f32 %v218_v34, %v251_v48 }
 0x3b2   :  { %v257_v50 = vmul.f32 1.442695, %v255_v49 }
 0x3b4   :  { %1148 = vpow2.f32 %v257_v50 }
 0x3ba   :  { %v1149_v51 = vpop.eup %1148 }
 0x3bb   :  { %v261_v52 = vsel %vm248_vm9, %v1149_v51, 0.0 }
 0x3bc   :  { %262 = vadd.xlane.f32.xlu0 %v261_v52 }
 0x3c7   :  { %v538_v53 = vpop.permute.xlu1 %537 }
 0x3cf   :  { %v671_v54 = vpop.permute.xlu1 %670 }
 0x3d0   :  { %1103 = vmatpush.xpose.msk.msra.mxu1 %vm196_vm8, %v671_v54  ;;  %535 = vrot.lane.b32.xlu0 %v1383_v8, %s1207_s30 }
 0x3d7   :  { %v669_v19 = vpop.permute.xlu1 %668 }
 0x3d8   :  { %585 = vrot.lane.b32.xlu0 %v1394_v16, %s1207_s30 }
 0x3df   :  { %v697_v32 = vpop.permute.xlu1 %696 }
 0x3e0   :  { %698 = vrot.lane.b32.xlu0 %v1383_v8, %s1208_s14 }
 0x3f9   :  { %v314_v55 = vpop.f32.mrf.mxu3 }
 0x401   :  { %v370_v56 = vpop.f32.mrf.mxu3 }
 0x402   :  { %v376_v57 = vsel %vm248_vm9, %v370_v56, -inf }
 0x403   :  { %377 = vmax.xlane.f32.xlu2 %v376_v57 }
 0x409   :  { %v419_v58 = vpop.f32.mrf.mxu2 }
 0x411   :  { %v532_v59 = vpop.f32.mrf.mxu2 }
 0x412   :  { %v563_v60 = vsel %vm248_vm9, %v532_v59, -inf }
 0x413   :  { %564 = vmax.xlane.f32.xlu2 %v563_v60 }
 0x42f   :  { %v263_v63 = vpop.xlane.xlu0 %262 }
 0x430   :  { %1150 = vrcp.f32 %v263_v63 }
 0x436   :  { %v1151_v1 = vpop.eup %1150 }
 0x437   :  { %v269_v3 = vmul.f32 %v1151_v1, %v1149_v51 }
 0x439   :  { %1083 = vmatmul.msk.f32.vlgmr.msra.gmra.mxu0 %vm248_vm9, %v269_v3 }
 0x43a   :  { %657 = vmatpush.msra.mxu0 %v190_v37 }
 0x43c   :  { %658 = vmatpush.msra.mxu0 %v189_v38 }
 0x441   :  { %1091 = vmatmul.msk.f32.vlgmr.msrb.gmra.mxu0 %vm196_vm8, %v419_v58 }
 0x442   :  { %v536_v4 = vpop.permute.xlu0 %535 }
 0x44a   :  { %v586_v5 = vpop.permute.xlu0 %585 }
 0x44b   :  { %606 = vmatpush.msrb.mxu2 %v586_v5 }
 0x452   :  { %v699_v6 = vpop.permute.xlu0 %698 }
 0x453   :  { %1105 = vmatpush.xpose.msk.msra.mxu2 %vm196_vm8, %v699_v6  ;;  %v191_v6 = vld [vmem:[%s1716_s5 + $0x30] sm:$0xff] }
 0x476   :  { %v378_v7 = vpop.xlane.xlu2 %377 }
 0x477   :  { %v380_v8 = vsub.f32 %v370_v56, %v378_v7 }
 0x479   :  { %v383_v9 = vmul.f32 1.442695, %v380_v8 }
 0x47b   :  { %1152 = vpow2.f32 %v383_v9 }
 0x481   :  { %v1153_v11 = vpop.eup %1152 }
 0x482   :  { %v388_v12 = vsel %vm248_vm9, %v1153_v11, 0.0 }
 0x483   :  { %389 = vadd.xlane.f32.xlu2 %v388_v12 }
 0x486   :  { %v565_v14 = vpop.xlane.xlu2 %564 }
 0x487   :  { %v569_v15 = vsub.f32 %v532_v59, %v565_v14 }
 0x489   :  { %v571_v17 = vmul.f32 1.442695, %v569_v15 }
 0x48b   :  { %1154 = vpow2.f32 %v571_v17 }
 0x491   :  { %v1155_v20 = vpop.eup %1154 }
 0x492   :  { %v575_v21 = vsel %vm248_vm9, %v1155_v20, 0.0 }
 0x49b   :  { %423 = vrot.lane.b32.xlu2 %v1387_v13, %s1203_s28  ;;  %s1210_s28 = smov [#allocation2]  }
 0x49c   :  { %s1061_s0 = sshll.u32 %s1210_s28, 4  ;;  %s1062_s0 = int_to_ptr.vmem [resolvable:$true] %s1061_s0 }
 0x4b6   :  { %v291_v18 = vpop.f32.mrf.mxu0 }
 0x4b7   :  { %1093 = vmatmul.msk.f32.vlgmr.msrb.gmra.mxu1 %vm196_vm8, %v291_v18  ;;  %v1130_v18 = vld [vmem:[%s1717_s6] ss:$0 sm:$0xff]  ;;  %s1063_s6 = sshll.u32 %s1724_s13, 4  ;;  %s1064_s6 = int_to_ptr.hbm [resolvable:$true] %s1063_s6 }
 0x4bf   :  { %1104 = vmatmul.msk.f32.vlgmr.msra.gmra.mxu1 %vm196_vm8, %v669_v19 }
 0x4c4   :  { %576 = vadd.xlane.f32.xlu2 %v575_v21 }
 0x4f6   :  { %v390_v22 = vpop.xlane.xlu2 %389 }
 0x4f7   :  { %1156 = vrcp.f32 %v390_v22 }
 0x4fd   :  { %v1157_v23 = vpop.eup %1156 }
 0x4fe   :  { %v394_v24 = vmul.f32 %v1157_v23, %v1153_v11  ;;  %v424_v25 = vpop.permute.xlu2 %423  ;;  %v472_v11 = vpop.f32.mrf.mxu0 }
 0x4ff   :  { %444 = vmatpush.msrb.mxu3 %v424_v25 }
 0x500   :  { %1090 = vmatmul.msk.f32.vlgmr.msrb.gmra.mxu3 %vm248_vm9, %v394_v24 }
 0x501   :  { %1115 = vmatpush.msra.mxu3 %v1430_v46 }
 0x503   :  { %1116 = vmatpush.msra.mxu3 %v1435_v47 }
 0x505   :  { %1097 = vmatpush.xpose.msk.msrb.mxu3 %vm196_vm8, %v538_v53 }
 0x508   :  { %1094 = vmatmul.msk.f32.vlgmr.msra.gmra.mxu3 %vm196_vm8, %v314_v55 }
 0x510   :  { %1098 = vmatmul.msk.f32.vlgmr.msrb.gmra.mxu3 %vm196_vm8, %v536_v4 }
 0x534   :  { %v1470_v26 = vpop.f32.mrf.mxu1 }
 0x535   :  { %v502_v15 = vadd.f32 %v1470_v26, %v472_v11  ;;  %v984_v11 = vld [vmem:[%s1722_s11 + $0x68] sm:$0xff] }
 0x537   :  { %v577_v27 = vpop.xlane.xlu2 %576 }
 0x538   :  { %1158 = vrcp.f32 %v577_v27 }
 0x53c   :  { %v693_v28 = vpop.f32.mrf.mxu1 }
 0x53d   :  { %v724_v29 = vsel %vm248_vm9, %v693_v28, -inf }
 0x53e   :  { %v1159_v30 = vpop.eup %1158  ;;  %725 = vmax.xlane.f32.xlu1 %v724_v29 }
 0x53f   :  { %v583_v31 = vmul.f32 %v1159_v30, %v1155_v20 }
 0x541   :  { %1099 = vmatmul.msk.f32.vlgmr.msrb.gmra.mxu2 %vm248_vm9, %v583_v31 }
 0x549   :  { %1106 = vmatmul.msk.f32.vlgmr.msra.gmra.mxu2 %vm196_vm8, %v697_v32 }
 0x583   :  { %v446_v33 = vpop.f32.mrf.mxu3 }
 0x584   :  { %1092 = vmatmul.msk.f32.gmra.mxu0 %vm196_vm8, %v446_v33 }
 0x58b   :  { %v1476_v34 = vpop.f32.mrf.mxu3 }
 0x593   :  { %v560_v35 = vpop.f32.mrf.mxu3 }
 0x594   :  { %v566_v36 = vsel %vm248_vm9, %v560_v35, -inf }
 0x595   :  { %567 = vmax.xlane.f32.xlu0 %v566_v36 }
 0x5a9   :  { %611 = vrot.lane.b32.xlu0 %v1387_v13, %s1207_s30 }
 0x5b1   :  { %v726_v39 = vpop.xlane.xlu1 %725 }
 0x5b2   :  { %v730_v40 = vsub.f32 %v693_v28, %v726_v39 }
 0x5b4   :  { %v732_v42 = vmul.f32 1.442695, %v730_v40  ;;  %v907_v40 = vld [vmem:[%s1720_s9 + $0x70] sm:$0xff] }
 0x5b5   :  { %929 = vmatpush.msrb.mxu0 %v907_v40  ;;  %v974_v40 = vld [vmem:[%s1722_s11 + $0x18] sm:$0xff] }
 0x5b6   :  { %1160 = vpow2.f32 %v732_v42  ;;  %v905_v42 = vld [vmem:[%s1720_s9 + $0x60] sm:$0xff] }
 0x5b7   :  { %930 = vmatpush.msrb.mxu0 %v905_v42 }
 0x5bc   :  { %v1161_v45 = vpop.eup %1160 }
 0x5bd   :  { %v736_v46 = vsel %vm248_vm9, %v1161_v45, 0.0 }
 0x5c4   :  { %v608_v41 = vpop.f32.mrf.mxu2 }
 0x5c5   :  { %1101 = vmatmul.msk.f32.vlgmr.msra.gmra.mxu0 %vm196_vm8, %v608_v41  ;;  %v908_v41 = vld [vmem:[%s1720_s9 + $0x78] sm:$0xff] }
 0x5cc   :  { %v721_v43 = vpop.f32.mrf.mxu2 }
 0x5cd   :  { %v727_v44 = vsel %vm248_vm9, %v721_v43, -inf }
 0x5ce   :  { %728 = vmax.xlane.f32.xlu2 %v727_v44  ;;  %v903_v44 = vld [vmem:[%s1720_s9 + $0x50] sm:$0xff] }
 0x5cf   :  { %931 = vmatpush.msrb.mxu0 %v903_v44 }
 0x5d6   :  { %737 = vadd.xlane.f32.xlu2 %v736_v46  ;;  %v901_v46 = vld [vmem:[%s1720_s9 + $0x40] sm:$0xff] }
 0x5d7   :  { %932 = vmatpush.msrb.mxu0 %v901_v46  ;;  %v973_v46 = vld [vmem:[%s1722_s11 + $0x10] sm:$0xff] }
 0x601   :  { %v475_v12 = vpop.f32.mrf.mxu0 }
 0x602   :  { %v505_v25 = vadd.f32 %v1476_v34, %v475_v12  ;;  %v1001_v12 = vld [vmem:[%s1722_s11 + $0xf0] sm:$0xff] }
 0x608   :  { %v568_v47 = vpop.xlane.xlu0 %567 }
 0x609   :  { %v570_v48 = vsub.f32 %v560_v35, %v568_v47  ;;  %v902_v47 = vld [vmem:[%s1720_s9 + $0x48] sm:$0xff] }
 0x60b   :  { %v573_v49 = vmul.f32 1.442695, %v570_v48  ;;  %v899_v48 = vld [vmem:[%s1720_s9 + $0x30] sm:$0xff] }
 0x60c   :  { %933 = vmatpush.msrb.mxu0 %v899_v48  ;;  %v991_v48 = vld [vmem:[%s1722_s11 + $0xa0] sm:$0xff] }
 0x60d   :  { %1162 = vpow2.f32 %v573_v49  ;;  %v900_v49 = vld [vmem:[%s1720_s9 + $0x38] sm:$0xff] }
 0x613   :  { %v1163_v50 = vpop.eup %1162 }
 0x614   :  { %v578_v51 = vsel %vm248_vm9, %v1163_v50, 0.0 }
 0x615   :  { %579 = vadd.xlane.f32.xlu2 %v578_v51  ;;  %v898_v51 = vld [vmem:[%s1720_s9 + $0x28] sm:$0xff] }
 0x61b   :  { %v612_v52 = vpop.permute.xlu0 %611 }
 0x61c   :  { %632 = vmatpush.msra.mxu3 %v612_v52  ;;  %v895_v52 = vld [vmem:[%s1720_s9 + $0x10] sm:$0xff] }
 0x62d   :  { %746 = vrot.lane.b32.xlu2 %v1394_v16, %s1209_s15 }
 0x641   :  { %v729_v53 = vpop.xlane.xlu2 %728 }
 0x642   :  { %v731_v54 = vsub.f32 %v721_v43, %v729_v53  ;;  %v660_v14 = vpop.f32.mrf.mxu0  ;;  %v906_v43 = vld [vmem:[%s1720_s9 + $0x68] sm:$0xff]  ;;  %v896_v53 = vld [vmem:[%s1720_s9 + $0x18] sm:$0xff] }
 0x643   :  { %v666_v17 = vadd.f32 %v660_v14, %v502_v15  ;;  %v1000_v15 = vld [vmem:[%s1722_s11 + $0xe8] sm:$0xff] }
 0x644   :  { %v734_v55 = vmul.f32 1.442695, %v731_v54  ;;  %v893_v54 = vld [vmem:[%s1720_s9] sm:$0xff] }
 0x646   :  { %1164 = vpow2.f32 %v734_v55  ;;  %v894_v55 = vld [vmem:[%s1720_s9 + $0x8] sm:$0xff] }
 0x649   :  { %v738_v58 = vpop.xlane.xlu2 %737 }
 0x64c   :  { %v1165_v56 = vpop.eup %1164 }
 0x64d   :  { %v739_v57 = vsel %vm248_vm9, %v1165_v56, 0.0 }
 0x64e   :  { %740 = vadd.xlane.f32.xlu1 %v739_v57 }
 0x667   :  { %772 = vrot.lane.b32.xlu1 %v1387_v13, %s1209_s15  ;;  %v192_v13 = vld [vmem:[%s1716_s5 + $0x38] sm:$0xff] }
 0x668   :  { %818 = vmatpush.msrb.mxu2 %v192_v13 }
 0x66a   :  { %819 = vmatpush.msrb.mxu2 %v191_v6 }
 0x688   :  { %v580_v59 = vpop.xlane.xlu2 %579 }
 0x689   :  { %1166 = vrcp.f32 %v580_v59 }
 0x68a   :  { %1168 = vrcp.f32 %v738_v58 }
 0x68f   :  { %v1167_v60 = vpop.eup %1166 }
 0x690   :  { %v584_v61 = vmul.f32 %v1167_v60, %v1163_v50  ;;  %v747_v62 = vpop.permute.xlu2 %746  ;;  %v1169_v16 = vpop.eup %1168  ;;  %v897_v50 = vld [vmem:[%s1720_s9 + $0x20] sm:$0xff] }
 0x691   :  { %767 = vmatpush.msrb.mxu3 %v747_v62  ;;  %v744_v63 = vmul.f32 %v1169_v16, %v1161_v45  ;;  %v904_v45 = vld [vmem:[%s1720_s9 + $0x58] sm:$0xff]  ;;  %934 = vmatpush.msrb.mxu0 %v897_v50 }
 0x692   :  { %1100 = vmatmul.msk.f32.vlgmr.msra.gmra.mxu3 %vm248_vm9, %v584_v61  ;;  %v990_v50 = vld [vmem:[%s1722_s11 + $0x98] sm:$0xff] }
 0x693   :  { %952 = vmatpush.msra.mxu3 %v908_v41  ;;  %935 = vmatpush.msrb.mxu0 %v895_v52  ;;  %v988_v52 = vld [vmem:[%s1722_s11 + $0x88] sm:$0xff] }
 0x695   :  { %953 = vmatpush.msra.mxu3 %v906_v43  ;;  %936 = vmatpush.msrb.mxu0 %v893_v54  ;;  %v909_v54 = vld [vmem:[%s1721_s10] sm:$0x3] }
 0x697   :  { %954 = vmatpush.msra.mxu3 %v904_v45 }
 0x699   :  { %955 = vmatpush.msra.mxu3 %v902_v47  ;;  %v992_v47 = vld [vmem:[%s1722_s11 + $0xa8] sm:$0xff] }
 0x69a   :  { %1107 = vmatmul.msk.f32.vlgmr.msrb.gmra.mxu3 %vm248_vm9, %v744_v63 }
 0x69b   :  { %956 = vmatpush.msra.mxu3 %v900_v49  ;;  %v971_v49 = vld [vmem:[%s1722_s11] sm:$0xff] }
 0x69d   :  { %957 = vmatpush.msra.mxu3 %v898_v51  ;;  %v989_v51 = vld [vmem:[%s1722_s11 + $0x90] sm:$0xff] }
 0x69f   :  { %958 = vmatpush.msra.mxu3 %v896_v53  ;;  %v987_v53 = vld [vmem:[%s1722_s11 + $0x80] sm:$0xff] }
 0x6a1   :  { %959 = vmatpush.msra.mxu3 %v894_v55  ;;  %v911_v55 = vperm.slane %v909_v54, 0 }
 0x6c1   :  { %v741_v1 = vpop.xlane.xlu1 %740 }
 0x6c2   :  { %1170 = vrcp.f32 %v741_v1  ;;  %v1585_v1 = vld [vmem:[%s1718_s7] ss:$0 sm:$0xff] }
 0x6c8   :  { %v1171_v3 = vpop.eup %1170 }
 0x6c9   :  { %v745_v4 = vmul.f32 %v1171_v3, %v1165_v56 }
 0x6d9   :  { %v773_v5 = vpop.permute.xlu1 %772 }
 0x6da   :  { %793 = vmatpush.msrb.mxu1 %v773_v5  ;;  %v1590_v5 = vld [vmem:[%s1719_s8] ss:$0 sm:$0xff] }
 0x6db   :  { %1108 = vmatmul.msk.f32.vlgmr.msrb.gmra.mxu1 %vm248_vm9, %v745_v4 }
 0x715   :  { %v634_v7 = vpop.f32.mrf.mxu3 }
 0x716   :  { %1102 = vmatmul.msk.f32.gmra.mxu0 %vm196_vm8, %v634_v7  ;;  %v986_v7 = vld [vmem:[%s1722_s11 + $0x78] sm:$0xff] }
 0x717   :  { %1007 = vmatpush.msra.mxu1 %v986_v7 }
 0x71d   :  { %v769_v8 = vpop.f32.mrf.mxu3 }
 0x71e   :  { %1109 = vmatmul.msk.f32.vlgmr.msrb.gmra.mxu2 %vm196_vm8, %v769_v8  ;;  %v985_v8 = vld [vmem:[%s1722_s11 + $0x70] sm:$0xff] }
 0x71f   :  { %1008 = vmatpush.msra.mxu1 %v985_v8 }
 0x721   :  { %1009 = vmatpush.msra.mxu1 %v984_v11 }
 0x758   :  { %v795_v9 = vpop.f32.mrf.mxu1 }
 0x759   :  { %1110 = vmatmul.msk.f32.gmra.mxu2 %vm196_vm8, %v795_v9  ;;  %v1002_v9 = vld [vmem:[%s1722_s11 + $0xf8] sm:$0xff] }
 0x75a   :  { %1030 = vmatpush.msra.mxu2 %v1002_v9 }
 0x75c   :  { %1031 = vmatpush.msra.mxu2 %v1001_v12 }
 0x75e   :  { %1032 = vmatpush.msra.mxu2 %v1000_v15 }
 0x793   :  { %v663_v24 = vpop.f32.mrf.mxu0 }
 0x794   :  { %v667_v27 = vadd.f32 %v663_v24, %v505_v25  ;;  %v997_v24 = vld [vmem:[%s1722_s11 + $0xd0] sm:$0xff]  ;;  %v980_v25 = vld [vmem:[%s1722_s11 + $0x48] sm:$0xff] }
 0x7a1   :  { %v821_v19 = vpop.f32.mrf.mxu2 }
 0x7a2   :  { %v827_v20 = vadd.f32 %v821_v19, %v666_v17  ;;  %v999_v19 = vld [vmem:[%s1722_s11 + $0xe0] sm:$0xff] }
 0x7a3   :  { %1033 = vmatpush.msra.mxu2 %v999_v19 }
 0x7a4   :  { %v833_v21 = vadd.f32 %v1130_v18, %v827_v20 }
 0x7a6   :  { %v1513_v22 = vadd.f32 %v833_v21, %v1286_v0  ;;  %v982_v21 = vld [vmem:[%s1722_s11 + $0x58] sm:$0xff] }
 0x7a8   :  { %v839_v23 = vsel %vm49_vm0, %v1513_v22, 0.0 }
 0x7a9   :  { %840 = vadd.xlane.f32.xlu0 %v839_v23  ;;  %v981_v23 = vld [vmem:[%s1722_s11 + $0x50] sm:$0xff] }
 0x7dc   :  { %v824_v26 = vpop.f32.mrf.mxu2 }
 0x7dd   :  { %v828_v28 = vadd.f32 %v824_v26, %v667_v27  ;;  %v996_v27 = vld [vmem:[%s1722_s11 + $0xc8] sm:$0xff]  ;;  %v979_v26 = vld [vmem:[%s1722_s11 + $0x40] sm:$0xff] }
 0x7df   :  { %v834_v29 = vadd.f32 %v1130_v18, %v828_v28  ;;  %v983_v18 = vld [vmem:[%s1722_s11 + $0x60] sm:$0xff] }
 0x7e0   :  { %1010 = vmatpush.msra.mxu1 %v983_v18  ;;  %v995_v28 = vld [vmem:[%s1722_s11 + $0xc0] sm:$0xff] }
 0x7e1   :  { %v1519_v30 = vadd.f32 %v834_v29, %v1293_v2 }
 0x7e2   :  { %1011 = vmatpush.msra.mxu1 %v982_v21 }
 0x7e3   :  { %v842_v31 = vsel %vm49_vm0, %v1519_v30, 0.0 }
 0x7e4   :  { %843 = vadd.xlane.f32.xlu2 %v842_v31  ;;  %1012 = vmatpush.msra.mxu1 %v981_v23  ;;  %v978_v31 = vld [vmem:[%s1722_s11 + $0x38] sm:$0xff] }
 0x7e6   :  { %1013 = vmatpush.msra.mxu1 %v980_v25 }
 0x7e8   :  { %1014 = vmatpush.msra.mxu1 %v979_v26 }
 0x7ea   :  { %1015 = vmatpush.msra.mxu1 %v978_v31 }
 0x81c   :  { %v841_v0 = vpop.xlane.xlu0 %840 }
 0x81d   :  { %v845_v32 = vmul.f32 %v841_v0, %v1297_v10 }
 0x81f   :  { %v847_v33 = vsub.f32 %v1513_v22, %v845_v32  ;;  %v994_v32 = vld [vmem:[%s1722_s11 + $0xb8] sm:$0xff] }
 0x821   :  { %v849_v35 = vmul.f32 %v847_v33, %v847_v33 }
 0x823   :  { %v851_v36 = vsel %vm49_vm0, %v849_v35, 0.0 }
 0x824   :  { %852 = vadd.xlane.f32.xlu1 %v851_v36  ;;  %v993_v36 = vld [vmem:[%s1722_s11 + $0xb0] sm:$0xff] }
 0x857   :  { %v844_v34 = vpop.xlane.xlu2 %843 }
 0x858   :  { %v846_v37 = vmul.f32 %v844_v34, %v1297_v10  ;;  %v976_v34 = vld [vmem:[%s1722_s11 + $0x28] sm:$0xff] }
 0x85a   :  { %v1528_v38 = vsub.f32 %v1519_v30, %v846_v37 }
 0x85c   :  { %v850_v2 = vmul.f32 %v1528_v38, %v1528_v38 }
 0x85e   :  { %v854_v39 = vsel %vm49_vm0, %v850_v2, 0.0  ;;  %v975_v2 = vld [vmem:[%s1722_s11 + $0x20] sm:$0xff] }
 0x85f   :  { %855 = vadd.xlane.f32.xlu0 %v854_v39 }
 0x897   :  { %v853_v56 = vpop.xlane.xlu1 %852 }
 0x898   :  { %v857_v57 = vmul.f32 %v853_v56, %v1297_v10 }
 0x89a   :  { %v859_v58 = vadd.f32 1e-05, %v857_v57 }
 0x89c   :  { %1172 = vrsqrt.f32 %v859_v58  ;;  %vm867_vm11 = vweird.f32 %v859_v58 }
 0x8a2   :  { %v1173_v59 = vpop.eup %1172 }
 0x8a3   :  { %v862_v60 = vmul.f32 %v1173_v59, %v859_v58  ;;  %vm868_vm10 = vweird.f32 %v1173_v59 }
 0x8a4   :  { %vm869_vm12 = vmor %vm867_vm11, %vm868_vm10 }
 0x8a5   :  { %v863_v61 = vmul.f32 %v1173_v59, %v862_v60 }
 0x8a7   :  { %v864_v62 = vmul.f32 0.5, %v863_v61 }
 0x8a9   :  { %v865_v16 = vsub.f32 1.5, %v864_v62 }
 0x8ab   :  { %v866_v63 = vmul.f32 %v1173_v59, %v865_v16 }
 0x8ad   :  { %v870_v3 = vsel %vm869_vm12, %v1173_v59, %v866_v63  ;;  %v912_v59 = vperm.slane %v909_v54, 1 }
 0x8ae   :  { %v881_v4 = vmul.f32 %v870_v3, %v847_v33  ;;  %v977_v33 = vld [vmem:[%s1722_s11 + $0x30] sm:$0xff] }
 0x8af   :  { %1016 = vmatpush.msra.mxu1 %v977_v33 }
 0x8b0   :  { %v886_v13 = vmul.f32 %v1585_v1, %v881_v4 }
 0x8b1   :  { %1017 = vmatpush.msra.mxu1 %v976_v34 }
 0x8b2   :  { %v891_v6 = vadd.f32 %v1590_v5, %v886_v13  ;;  %v1133_v13 = vld [vmem:[%s1723_s12] ss:$0 sm:$0xff]  ;;  %s1211_s12 = smov 128  }
 0x8b3   :  { %1018 = vmatpush.msra.mxu1 %v975_v2 }
 0x8b4   :  { %1111 = vmatmul.msk.f32.vlgmr.msrb.gmra.mxu0 %vm49_vm0, %v891_v6  ;;  %1113 = vmatmul.msk.f32.vlgmr.msra.gmra.mxu3 %vm49_vm0, %v891_v6 }
 0x8b5   :  { %1019 = vmatpush.msra.mxu1 %v974_v40 }
 0x8b7   :  { %1020 = vmatpush.msra.mxu1 %v973_v46 }
 0x8d2   :  { %v856_v14 = vpop.xlane.xlu0 %855 }
 0x8d3   :  { %v858_v17 = vmul.f32 %v856_v14, %v1297_v10  ;;  %v998_v10 = vld [vmem:[%s1722_s11 + $0xd8] sm:$0xff] }
 0x8d4   :  { %1034 = vmatpush.msra.mxu2 %v998_v10 }
 0x8d5   :  { %v860_v20 = vadd.f32 1e-05, %v858_v17 }
 0x8d6   :  { %1035 = vmatpush.msra.mxu2 %v997_v24 }
 0x8d7   :  { %1174 = vrsqrt.f32 %v860_v20  ;;  %vm877_vm14 = vweird.f32 %v860_v20 }
 0x8d8   :  { %1036 = vmatpush.msra.mxu2 %v996_v27 }
 0x8da   :  { %1037 = vmatpush.msra.mxu2 %v995_v28 }
 0x8dc   :  { %1038 = vmatpush.msra.mxu2 %v994_v32 }
 0x8dd   :  { %v1175_v29 = vpop.eup %1174 }
 0x8de   :  { %v872_v0 = vmul.f32 %v1175_v29, %v860_v20  ;;  %1039 = vmatpush.msra.mxu2 %v993_v36  ;;  %vm878_vm13 = vweird.f32 %v1175_v29 }
 0x8df   :  { %vm879_vm15 = vmor %vm877_vm14, %vm878_vm13 }
 0x8e0   :  { %v873_v35 = vmul.f32 %v1175_v29, %v872_v0  ;;  %1040 = vmatpush.msra.mxu2 %v992_v47 }
 0x8e2   :  { %v874_v37 = vmul.f32 0.5, %v873_v35  ;;  %1041 = vmatpush.msra.mxu2 %v991_v48 }
 0x8e4   :  { %v875_v39 = vsub.f32 1.5, %v874_v37  ;;  %1042 = vmatpush.msra.mxu2 %v990_v50 }
 0x8e6   :  { %v876_v41 = vmul.f32 %v1175_v29, %v875_v39  ;;  %1043 = vmatpush.msra.mxu2 %v989_v51 }
 0x8e8   :  { %v880_v42 = vsel %vm879_vm15, %v1175_v29, %v876_v41  ;;  %1044 = vmatpush.msra.mxu2 %v988_v52 }
 0x8e9   :  { %v882_v43 = vmul.f32 %v880_v42, %v1528_v38  ;;  %v972_v38 = vld [vmem:[%s1722_s11 + $0x8] sm:$0xff] }
 0x8ea   :  { %1021 = vmatpush.msra.mxu1 %v972_v38  ;;  %1045 = vmatpush.msra.mxu2 %v987_v53 }
 0x8eb   :  { %v887_v44 = vmul.f32 %v1585_v1, %v882_v43 }
 0x8ec   :  { %1022 = vmatpush.msra.mxu1 %v971_v49 }
 0x8ed   :  { %v892_v45 = vadd.f32 %v1590_v5, %v887_v44 }
 0x8ef   :  { %1112 = vmatmul.msk.f32.gmra.mxu0 %vm49_vm0, %v892_v45  ;;  %1114 = vmatmul.msk.f32.gmra.mxu3 %vm49_vm0, %v892_v45 }
 0x931   :  { %v938_v56 = vpop.f32.mrf.mxu0 }
 0x932   :  { %v939_v57 = vadd.f32 %v938_v56, %v911_v55 }
 0x934   :  { %v967_v58 = vmax.f32 %v939_v57, 0.0 }
 0x936   :  { %1023 = vmatmul.f32.vlgmr.msra.gmra.mxu1 %v967_v58 }
 0x937   :  { %v961_v60 = vpop.f32.mrf.mxu3 }
 0x938   :  { %v962_v61 = vadd.f32 %v961_v60, %v912_v59 }
 0x93a   :  { %v968_v62 = vmax.f32 %v962_v61, 0.0 }
 0x93c   :  { %1046 = vmatmul.f32.vlgmr.msra.gmra.mxu2 %v968_v62 }
 0x96c   :  { %v941_v16 = vpop.f32.mrf.mxu0 }
 0x96d   :  { %v942_v63 = vadd.f32 %v941_v16, %v911_v55 }
 0x96f   :  { %v969_v1 = vmax.f32 %v942_v63, 0.0 }
 0x971   :  { %1026 = vmatmul.f32.gmra.mxu1 %v969_v1 }
 0x972   :  { %v964_v3 = vpop.f32.mrf.mxu3 }
 0x973   :  { %v965_v4 = vadd.f32 %v964_v3, %v912_v59 }
 0x975   :  { %v970_v5 = vmax.f32 %v965_v4, 0.0 }
 0x977   :  { %1049 = vmatmul.f32.gmra.mxu2 %v970_v5 }
 0x9b3   :  { %v1024_v6 = vpop.f32.mrf.mxu1 }
 0x9b4   :  { %v1025_v7 = vadd.f32 %v1133_v13, %v1024_v6 }
 0x9bf   :  { %v1047_v8 = vpop.f32.mrf.mxu2 }
 0x9c0   :  { %v1048_v9 = vadd.f32 %v1047_v8, %v1025_v7 }
 0x9c2   :  { %v1053_v11 = vadd.f32 %v1048_v9, %v1513_v22 }
 0x9c4   :  { %1055 = vst.msk [vmem:[#allocation2] sm:$0xff] %vm49_vm0, %v1053_v11 }
 0x9ee   :  { %v1027_v12 = vpop.f32.mrf.mxu1 }
 0x9ef   :  { %v1028_v14 = vadd.f32 %v1133_v13, %v1027_v12 }
 0x9fa   :  { %v1050_v15 = vpop.f32.mrf.mxu2 }
 0x9fb   :  { %v1051_v17 = vadd.f32 %v1050_v15, %v1028_v14 }
 0x9fd   :  { %v1054_v18 = vadd.f32 %v1051_v17, %v1519_v30 }
 0x9ff   :  { %1056 = vst.msk [vmem:[#allocation2 + $0x8] sm:$0xff] %vm49_vm0, %v1054_v18 }
 0xa00   :  { %1069 = dma.vmem_to_hbm [thread:$0]  %s1062_s0, 256, %s1064_s6, [#allocation3], %s1211_s12, %s1211_s12, %s1212_s4  }
 0xa01   :  { %1200 = dma.done.wait [#allocation3], 256  }
 0xa02   :  { %1201 = vsyncadd [#allocation3], 4294967040 }
 0xa03   :  { %1074 = vsyncpa [#allocation3], 1 }

</bundles_post_ra>
